<compile_context>
chip_gen: v6e
topology: v6e:2x2x1
jax: 0.10.0
libtpu: 0.0.40
codegen_flags: <defaults>
</compile_context>

<pallas_src>
import functools
import math

import jax
import jax.numpy as jnp
from jax.experimental import pallas as pl
from jax.experimental.pallas import tpu as pltpu

_VMEM_LIMIT = 32 * 1024 * 1024  # safe on v5e/v6e (128 MiB) and v7x (64 MiB)
_NEG_INF = -1e30                # large negative instead of -inf (no inf-inf NaNs)


def _pick_tile(dim, preferred, align):
    """Largest tile <= preferred that is a multiple of `align` and divides `dim`.

    Falls back to the full dimension (always a legal block shape)."""
    if dim <= preferred:
        return dim
    t = (preferred // align) * align
    while t >= align:
        if dim % t == 0:
            return t
        t -= align
    return dim


# ----------------------------------------------------------------------------
# Fused linear (matmul + bias), tiled and pipelined
# ----------------------------------------------------------------------------
def _linear_kernel(x_ref, w_ref, b_ref, o_ref, acc_ref):
    k = pl.program_id(2)

    @pl.when(k == 0)
    def _():
        acc_ref[...] = jnp.zeros_like(acc_ref)

    acc_ref[...] += jnp.dot(x_ref[...], w_ref[...],
                            preferred_element_type=jnp.float32)

    @pl.when(k == pl.num_programs(2) - 1)
    def _():
        o_ref[...] = (acc_ref[...] + b_ref[...]).astype(o_ref.dtype)


def pallas_linear(x, w, b, out_dtype, tm=256, tn=256, tk=512):
    """y = x @ w + b.  x: (M, K), w: (K, N) (compute dtype), b: (N,) f32."""
    M, K = x.shape
    K2, N = w.shape
    assert K == K2 and b.shape == (N,)
    tm = _pick_tile(M, tm, 8)
    tn = _pick_tile(N, tn, 128)
    tk = _pick_tile(K, tk, 128)
    grid = (M // tm, N // tn, K // tk)
    return pl.pallas_call(
        _linear_kernel,
        out_shape=jax.ShapeDtypeStruct((M, N), out_dtype),
        grid_spec=pltpu.PrefetchScalarGridSpec(
            num_scalar_prefetch=0,
            grid=grid,
            in_specs=[
                pl.BlockSpec((tm, tk), lambda i, j, k: (i, k)),
                pl.BlockSpec((tk, tn), lambda i, j, k: (k, j)),
                pl.BlockSpec((1, tn), lambda i, j, k: (0, j)),
            ],
            out_specs=pl.BlockSpec((tm, tn), lambda i, j, k: (i, j)),
            scratch_shapes=[pltpu.VMEM((tm, tn), jnp.float32)],
        ),
        compiler_params=pltpu.CompilerParams(
            dimension_semantics=("parallel", "parallel", "arbitrary"),
            vmem_limit_bytes=_VMEM_LIMIT,
        ),
    )(x, w, b.reshape(1, N))


# ----------------------------------------------------------------------------
# Flash-style attention over a fixed-size KV cache
# ----------------------------------------------------------------------------
def _flash_attn_kernel(len_ref, q_ref, k_ref, v_ref, o_ref,
                       m_sc, l_sc, acc_sc,
                       *, scale, causal, n_head, head_dim, block_k):
    kv = pl.program_id(1)
    n_kv = pl.num_programs(1)

    @pl.when(kv == 0)
    def _init():
        m_sc[...] = jnp.full_like(m_sc, _NEG_INF)
        l_sc[...] = jnp.zeros_like(l_sc)
        acc_sc[...] = jnp.zeros_like(acc_sc)

    cur_len = len_ref[0]
    tile_start = kv * block_k

    @pl.when(tile_start < cur_len)  # skip key tiles that are entirely padding
    def _compute():
        q2d = q_ref[0]              # (T, C)        compute dtype
        k2d = k_ref[0]              # (block_k, C)
        v2d = v_ref[0]
        t_q = q2d.shape[0]

        key_pos = tile_start + jax.lax.broadcasted_iota(
            jnp.int32, (t_q, block_k), 1)
        valid = key_pos < cur_len
        if causal:  # prefill: query i sits at absolute position i
            q_pos = jax.lax.broadcasted_iota(jnp.int32, (t_q, block_k), 0)
            valid = jnp.logical_and(valid, key_pos <= q_pos)

        for h in range(n_head):
            sl = slice(h * head_dim, (h + 1) * head_dim)
            qh = q2d[:, sl]                         # (T, D)
            kh = k2d[:, sl]                         # (block_k, D)
            vh = v2d[:, sl]
            s = jax.lax.dot_general(
                qh, kh, (((1,), (1,)), ((), ())),
                preferred_element_type=jnp.float32) * scale   # (T, block_k) f32
            s = jnp.where(valid, s, _NEG_INF)

            m_prev = m_sc[h]                                   # (T, 1)
            m_new = jnp.maximum(m_prev, jnp.max(s, axis=-1, keepdims=True))
            alpha = jnp.exp(m_prev - m_new)
            p = jnp.exp(s - m_new)
            l_sc[h] = alpha * l_sc[h] + jnp.sum(p, axis=-1, keepdims=True)
            acc_sc[h] = alpha * acc_sc[h] + jnp.dot(
                p.astype(vh.dtype), vh, preferred_element_type=jnp.float32)
            m_sc[h] = m_new

    @pl.when(kv == n_kv - 1)
    def _finalize():
        for h in range(n_head):
            inv_l = pl.reciprocal(l_sc[h], approx=True)        # (T, 1)
            o_ref[0, :, h * head_dim:(h + 1) * head_dim] = (
                acc_sc[h] * inv_l).astype(o_ref.dtype)


def flash_attention(q, k_cache, v_cache, cur_len, *, n_head, causal, block_k,
                    out_dtype):
    """q: (B, T, C); k/v_cache: (B, S_max, C); cur_len: (1,) int32 -> (B, T, C)."""
    B, T, C = q.shape
    S_max = k_cache.shape[1]
    assert S_max % block_k == 0 and C % n_head == 0
    D = C // n_head
    num_kv = S_max // block_k
    scale = 1.0 / math.sqrt(D)

    kernel = functools.partial(
        _flash_attn_kernel, scale=scale, causal=causal,
        n_head=n_head, head_dim=D, block_k=block_k)

    def q_map(b, kv, len_ref):
        return (b, 0, 0)

    def kv_map(b, kv, len_ref):
        # Clamp dead key tiles onto the last needed tile so they are not
        # re-DMAed (their compute is skipped inside the kernel).
        last_needed = (len_ref[0] + block_k - 1) // block_k - 1
        return (b, jnp.minimum(kv, last_needed), 0)

    grid_spec = pltpu.PrefetchScalarGridSpec(
        num_scalar_prefetch=1,
        grid=(B, num_kv),
        in_specs=[
            pl.BlockSpec((1, T, C), q_map),
            pl.BlockSpec((1, block_k, C), kv_map),
            pl.BlockSpec((1, block_k, C), kv_map),
        ],
        out_specs=pl.BlockSpec((1, T, C), q_map),
        scratch_shapes=[
            pltpu.VMEM((n_head, T, 1), jnp.float32),   # running max m
            pltpu.VMEM((n_head, T, 1), jnp.float32),   # running sum l
            pltpu.VMEM((n_head, T, D), jnp.float32),   # output accumulator
        ],
    )
    return pl.pallas_call(
        kernel,
        out_shape=jax.ShapeDtypeStruct((B, T, C), out_dtype),
        grid_spec=grid_spec,
        compiler_params=pltpu.CompilerParams(
            dimension_semantics=("parallel", "arbitrary"),
            vmem_limit_bytes=_VMEM_LIMIT,
        ),
    )(cur_len, q, k_cache, v_cache)


# ----------------------------------------------------------------------------
# In-place KV-cache update (fixed-shape cache, input_output_aliases)
# ----------------------------------------------------------------------------
def _kv_update_kernel(start_ref, k_new_ref, v_new_ref,
                      k_cache_in, v_cache_in, k_cache_out, v_cache_out, sems):
    # k_cache_in / v_cache_in alias the outputs; only the new rows are written.
    b = pl.program_id(0)
    start = start_ref[0]
    t_new = k_new_ref.shape[1]
    ck = pltpu.make_async_copy(
        k_new_ref.at[b], k_cache_out.at[b, pl.ds(start, t_new), :], sems.at[0])
    cv = pltpu.make_async_copy(
        v_new_ref.at[b], v_cache_out.at[b, pl.ds(start, t_new), :], sems.at[1])
    ck.start()
    cv.start()
    ck.wait()
    cv.wait()


def kv_cache_update(k_new, v_new, k_cache, v_cache, start):
    """Write k_new/v_new (B, T, C) into the caches (B, S_max, C) at `start`."""
    B = k_new.shape[0]
    any_spec = pl.BlockSpec(memory_space=pl.ANY)
    return pl.pallas_call(
        _kv_update_kernel,
        out_shape=(jax.ShapeDtypeStruct(k_cache.shape, k_cache.dtype),
                   jax.ShapeDtypeStruct(v_cache.shape, v_cache.dtype)),
        grid=(B,),
        in_specs=[pl.BlockSpec(memory_space=pltpu.MemorySpace.SMEM),
                  any_spec, any_spec, any_spec, any_spec],
        out_specs=(any_spec, any_spec),
        scratch_shapes=[pltpu.SemaphoreType.DMA((2,))],
        input_output_aliases={3: 0, 4: 1},
        compiler_params=pltpu.CompilerParams(
            dimension_semantics=("arbitrary",)),
    )(start, k_new, v_new, k_cache, v_cache)


# ----------------------------------------------------------------------------
# Module-level wrapper mirroring AttentionWithKVCache semantics
# ----------------------------------------------------------------------------
class AttentionWithKVCacheJAX:
    def __init__(self, n_emb, n_head, max_seq_len, key, kv_block=512,
                 compute_dtype=jnp.bfloat16):
        assert n_emb % n_head == 0
        self.n_emb = n_emb
        self.n_head = n_head
        self.max_seq_len = max_seq_len
        self.kv_block = min(kv_block, max_seq_len)
        assert max_seq_len % self.kv_block == 0
        self.compute_dtype = compute_dtype
        self.len = 0
        self.k_cache = None
        self.v_cache = None
        k1, k2, k3, k4 = jax.random.split(key, 4)
        # nn.Linear default init: U(-1/sqrt(fan_in), 1/sqrt(fan_in)).
        bnd = 1.0 / math.sqrt(n_emb)
        self.w_attn = jax.random.uniform(
            k1, (n_emb, 3 * n_emb), jnp.float32, -bnd, bnd).astype(compute_dtype)
        self.b_attn = jax.random.uniform(k2, (3 * n_emb,), jnp.float32, -bnd, bnd)
        self.w_proj = jax.random.uniform(
            k3, (n_emb, n_emb), jnp.float32, -bnd, bnd).astype(compute_dtype)
        self.b_proj = jax.random.uniform(k4, (n_emb,), jnp.float32, -bnd, bnd)

    def forward(self, x):
        B, T, C = x.shape
        assert C == self.n_emb
        if self.len == 0:
            # Preallocate fixed-shape caches once per generation.
            self.k_cache = jnp.zeros((B, self.max_seq_len, C), self.compute_dtype)
            self.v_cache = jnp.zeros((B, self.max_seq_len, C), self.compute_dtype)
        else:
            assert T == 1
        assert self.len + T <= self.max_seq_len

        qkv = pallas_linear(x.reshape(B * T, C).astype(self.compute_dtype),
                            self.w_attn, self.b_attn,
                            out_dtype=self.compute_dtype)
        qkv = qkv.reshape(B, T, 3 * C)
        q = qkv[:, :, :C]
        k_new = qkv[:, :, C:2 * C]
        v_new = qkv[:, :, 2 * C:]

        start = jnp.array([self.len], dtype=jnp.int32)
        self.k_cache, self.v_cache = kv_cache_update(
            k_new, v_new, self.k_cache, self.v_cache, start)

        cur_len = jnp.array([self.len + T], dtype=jnp.int32)
        y = flash_attention(q, self.k_cache, self.v_cache, cur_len,
                            n_head=self.n_head, causal=(self.len == 0),
                            block_k=self.kv_block,
                            out_dtype=self.compute_dtype)          # (B, T, C)

        out = pallas_linear(y.reshape(B * T, C), self.w_proj, self.b_proj,
                            out_dtype=jnp.float32).reshape(B, T, C)
        self.len += T
        return out


# ----------------------------------------------------------------------------
# Pure-JAX reference (same math and same bf16 cast points) for validation
# ----------------------------------------------------------------------------
class _Reference:
    def __init__(self, mod):
        self.mod = mod
        self.k = None
        self.v = None
        self.len = 0

    def step(self, x):
        mod = self.mod
        B, T, C = x.shape
        H, D = mod.n_head, C // mod.n_head
        cd = mod.compute_dtype
        scale = 1.0 / math.sqrt(D)
        qkv = (jnp.dot(x.reshape(B * T, C).astype(cd), mod.w_attn,
                       preferred_element_type=jnp.float32)
               + mod.b_attn).astype(cd).reshape(B, T, 3 * C)
        q, k, v = qkv[..., :C], qkv[..., C:2 * C], qkv[..., 2 * C:]
        if self.len == 0:
            self.k, self.v = k, v
        else:
            self.k = jnp.concatenate([self.k, k], axis=1)
            self.v = jnp.concatenate([self.v, v], axis=1)
        S = self.len + T
        qh = q.reshape(B, T, H, D).transpose(0, 2, 1, 3)
        kh = self.k.reshape(B, S, H, D).transpose(0, 2, 1, 3)
        vh = self.v.reshape(B, S, H, D).transpose(0, 2, 1, 3)
        s = jnp.einsum("bhtd,bhsd->bhts", qh, kh,
                       preferred_element_type=jnp.float32) * scale
        if self.len == 0:
            mask = jnp.tril(jnp.ones((T, S), dtype=bool))[None, None]
            s = jnp.where(mask, s, -jnp.inf)
        p = jax.nn.softmax(s, axis=-1)
        yh = jnp.einsum("bhts,bhsd->bhtd", p.astype(cd), vh,
                        preferred_element_type=jnp.float32)
        y = yh.transpose(0, 2, 1, 3).reshape(B, T, C).astype(cd)
        out = (jnp.dot(y.reshape(B * T, C), mod.w_proj,
                       preferred_element_type=jnp.float32)
               + mod.b_proj).reshape(B, T, C)
        self.len = S
        return out


if __name__ == "__main__":
    # Small config: batch=2, seq=8, n_emb=32, n_head=4 (head_dim=8).
    B, T, C, H = 2, 8, 32, 4
    MAX_SEQ, KV_BLOCK = 64, 8  # several key tiles -> exercises online softmax + masking

    key = jax.random.PRNGKey(0)
    k_param, k_x, k_d1, k_d2 = jax.random.split(key, 4)

    mod = AttentionWithKVCacheJAX(n_emb=C, n_head=H, max_seq_len=MAX_SEQ,
                                  kv_block=KV_BLOCK, key=k_param)
    ref = _Reference(mod)

    x_prefill = jax.random.normal(k_x, (B, T, C), jnp.float32)
    x_dec1 = jax.random.normal(k_d1, (B, 1, C), jnp.float32)
    x_dec2 = jax.random.normal(k_d2, (B, 1, C), jnp.float32)

    y0 = jax.block_until_ready(mod.forward(x_prefill))  # prefill (causal)
    y1 = jax.block_until_ready(mod.forward(x_dec1))     # decode step 1
    y2 = jax.block_until_ready(mod.forward(x_dec2))     # decode step 2 (reuses compiled kernels)

    assert y0.shape == (B, T, C) and y1.shape == (B, 1, C) and y2.shape == (B, 1, C)

    r0 = ref.step(x_prefill)
    r1 = ref.step(x_dec1)
    r2 = ref.step(x_dec2)

    for name, got, want in [("prefill", y0, r0), ("decode1", y1, r1),
                            ("decode2", y2, r2)]:
        err = float(jnp.max(jnp.abs(got - want)))
        assert jnp.allclose(got, want, atol=2e-2, rtol=2e-2), (
            f"{name} mismatch, max abs err {err}")

    print("KERNEL_OK")
</pallas_src>

<mosaic_0001>
module attributes {stable_mosaic.version = 11 : i64} {
  func.func @_linear_kernel(%arg0: i32, %arg1: i32, %arg2: i32, %arg3: memref<16x32xbf16, #tpu.memory_space<vmem>>, %arg4: memref<32x96xbf16, #tpu.memory_space<vmem>>, %arg5: memref<1x96xf32, #tpu.memory_space<vmem>>, %arg6: memref<16x96xbf16, #tpu.memory_space<vmem>>, %arg7: memref<16x96xf32, #tpu.memory_space<vmem>>) attributes {dimension_semantics = [#tpu.dimension_semantics<parallel>, #tpu.dimension_semantics<parallel>, #tpu.dimension_semantics<arbitrary>], iteration_bounds = array<i64: 1, 1, 1>, scalar_prefetch = 0 : i64, scratch_operands = 1 : i64, tpu.core_type = #tpu.core_type<tc>, window_params = [{transform_indices = @transform_0, window_bounds = array<i64: 16, 32>}, {transform_indices = @transform_1, window_bounds = array<i64: 32, 96>}, {transform_indices = @transform_2, window_bounds = array<i64: 1, 96>}, {transform_indices = @transform_3, window_bounds = array<i64: 16, 96>}]} {
    %c0_i32 = arith.constant 0 : i32
    %0 = arith.cmpi eq, %arg2, %c0_i32 : i32
    %1 = arith.extui %0 : i1 to i32
    %c0_i32_0 = arith.constant 0 : i32
    %2 = arith.cmpi ne, %1, %c0_i32_0 : i32
    scf.if %2 {
      %cst_10 = arith.constant 0.000000e+00 : f32
      %12 = vector.broadcast %cst_10 : f32 to vector<16x96xf32>
      %c0_11 = arith.constant 0 : index
      %c0_12 = arith.constant 0 : index
      %13 = vector.load %arg7[%c0_11, %c0_12] : memref<16x96xf32, #tpu.memory_space<vmem>>, vector<16x96xf32>
      tpu.vector_store %arg7[%c0_11, %c0_12], %12 {strides = array<i32>} : memref<16x96xf32, #tpu.memory_space<vmem>>, vector<16x96xf32>,
    } else {
    }
    %c0 = arith.constant 0 : index
    %c0_1 = arith.constant 0 : index
    %3 = vector.load %arg7[%c0, %c0_1] : memref<16x96xf32, #tpu.memory_space<vmem>>, vector<16x96xf32>
    %c0_2 = arith.constant 0 : index
    %c0_3 = arith.constant 0 : index
    %4 = vector.load %arg3[%c0_2, %c0_3] : memref<16x32xbf16, #tpu.memory_space<vmem>>, vector<16x32xbf16>
    %c0_4 = arith.constant 0 : index
    %c0_5 = arith.constant 0 : index
    %5 = vector.load %arg4[%c0_4, %c0_5] : memref<32x96xbf16, #tpu.memory_space<vmem>>, vector<32x96xbf16>
    %cst = arith.constant dense<0.000000e+00> : vector<16x96xf32>
    %6 = tpu.matmul %4, %5, %cst {dimension_numbers = #tpu.dot_dimension_numbers<[1], [0], [0], [1], [0, 0, 1, 1], [], []>} : vector<16x32xbf16>, vector<32x96xbf16>, vector<16x96xf32> -> vector<16x96xf32>
    %7 = arith.addf %3, %6 : vector<16x96xf32>
    %c0_6 = arith.constant 0 : index
    %c0_7 = arith.constant 0 : index
    %8 = vector.load %arg7[%c0_6, %c0_7] : memref<16x96xf32, #tpu.memory_space<vmem>>, vector<16x96xf32>
    tpu.vector_store %arg7[%c0_6, %c0_7], %7 {strides = array<i32>} : memref<16x96xf32, #tpu.memory_space<vmem>>, vector<16x96xf32>,
    %c0_i32_8 = arith.constant 0 : i32
    %9 = arith.cmpi eq, %arg2, %c0_i32_8 : i32
    %10 = arith.extui %9 : i1 to i32
    %c0_i32_9 = arith.constant 0 : i32
    %11 = arith.cmpi ne, %10, %c0_i32_9 : i32
    scf.if %11 {
      %c0_10 = arith.constant 0 : index
      %c0_11 = arith.constant 0 : index
      %12 = vector.load %arg7[%c0_10, %c0_11] : memref<16x96xf32, #tpu.memory_space<vmem>>, vector<16x96xf32>
      %c0_12 = arith.constant 0 : index
      %c0_13 = arith.constant 0 : index
      %13 = vector.load %arg5[%c0_12, %c0_13] : memref<1x96xf32, #tpu.memory_space<vmem>>, vector<1x96xf32>
      %14 = vector.broadcast %13 : vector<1x96xf32> to vector<16x96xf32>
      %15 = arith.addf %12, %14 : vector<16x96xf32>
      %16 = arith.truncf %15 : vector<16x96xf32> to vector<16x96xbf16>
      %c0_14 = arith.constant 0 : index
      %c0_15 = arith.constant 0 : index
      %17 = vector.load %arg6[%c0_14, %c0_15] : memref<16x96xbf16, #tpu.memory_space<vmem>>, vector<16x96xbf16>
      tpu.vector_store %arg6[%c0_14, %c0_15], %16 {strides = array<i32>} : memref<16x96xbf16, #tpu.memory_space<vmem>>, vector<16x96xbf16>,
    } else {
    }
    return
  }
  func.func @transform_0(%arg0: i32, %arg1: i32, %arg2: i32) -> (i32, i32) {
    %c0_i32 = arith.constant 0 : i32
    return %arg0, %arg2 : i32, i32
  }
  func.func @transform_1(%arg0: i32, %arg1: i32, %arg2: i32) -> (i32, i32) {
    %c0_i32 = arith.constant 0 : i32
    return %arg2, %arg1 : i32, i32
  }
  func.func @transform_2(%arg0: i32, %arg1: i32, %arg2: i32) -> (i32, i32) {
    %c0_i32 = arith.constant 0 : i32
    %c0_i32_0 = arith.constant 0 : i32
    return %c0_i32, %arg1 : i32, i32
  }
  func.func @transform_3(%arg0: i32, %arg1: i32, %arg2: i32) -> (i32, i32) {
    %c0_i32 = arith.constant 0 : i32
    return %arg0, %arg1 : i32, i32
  }
}

</mosaic_0001>

<bundles_post_ra>
// kernel: tpu_custom_call.1
= control target key start
LH: loop header
LB: loop body
LE: loop exit
PB: predicated region body
PF: predicated region fallthrough
CT: control target
= control target key end

     0   :  { %8 = vsyncpa [#allocation4], 0  ;;  %s317_s0 = inlined_call_operand.hbm [shape: bf16[16,32], index: 0, kind: input, shape index: {}]   ;;  %s318_s1 = inlined_call_operand.hbm [shape: bf16[32,96], index: 1, kind: input, shape index: {}]   ;;  %s319_s2 = inlined_call_operand.vmem [shape: f32[1,96], index: 2, kind: input, shape index: {}]   ;;  %s320_s3 = inlined_call_operand.hbm [shape: bf16[16,96], index: 3, kind: output, shape index: {}]  }
   0x1   :  { %9 = vsyncpa [#allocation7], 0 }
   0x2   :  { %10 = vsyncpa [#allocation5], 0  ;;  %s265_s12 = smov [#allocation3]  }
   0x3   :  { %s16_s13 = sshll.u32 %s265_s12, 4  ;;  %s17_s13 = int_to_ptr.vmem [resolvable:$true] %s16_s13 }
   0x4   :  { %s207_s14 = scalar_lea.vmem %s17_s13, 128  ;;  %p212_p1 = scmp.lt.s32.totalorder %s17_s13, %s17_s13 }
   0x5   :  { %p208_p0 = scmp.ne.s32.totalorder %s17_s13, %s207_s14  ;;  %p213_p2 = scmp.lt.s32.totalorder %s207_s14, %s207_s14 }
   0x7   :  { %p214_p3 = por %p213_p2, %p212_p1 }
   0x9   :  { %p215_p4 = pnand %p214_p3, %p208_p0 }
   0xb   :  { %218 = shalt.err (!%p215_p4)
}
   0xc   :  { %s266_s15 = smov 64   ;;  %s267_s16 = smov 4  }
   0xd   :  { %22 = dma.hbm_to_vmem [thread:$0]  %s317_s0, 128, %s17_s13, [#allocation4], %s266_s15, %s266_s15, %s267_s16  }
   0xe   :  { %s268_s19 = smov [#allocation6]  }
   0xf   :  { %s28_s20 = sshll.u32 %s268_s19, 4  ;;  %s29_s20 = int_to_ptr.vmem [resolvable:$true] %s28_s20 }
  0x10   :  { %s227_s21 = scalar_lea.vmem %s29_s20, 256  ;;  %p232_p6 = scmp.lt.s32.totalorder %s29_s20, %s29_s20 }
  0x11   :  { %p228_p5 = scmp.ne.s32.totalorder %s29_s20, %s227_s21  ;;  %p233_p7 = scmp.lt.s32.totalorder %s227_s21, %s227_s21 }
  0x13   :  { %p234_p8 = por %p233_p7, %p232_p6 }
  0x15   :  { %p235_p9 = pnand %p234_p8, %p228_p5 }
  0x17   :  { %238 = shalt.err (!%p235_p9)
}
  0x18   :  { %34 = dma.hbm_to_vmem [thread:$0]  %s318_s1, 256, %s29_s20, [#allocation7], %s266_s15, %s266_s15, %s267_s16  }
  0x19   :  { %259 = dma.done.wait [#allocation4], 128  }
  0x1a   :  { %260 = vsyncadd [#allocation4], 4294967168 }
  0x1b   :  { %261 = dma.done.wait [#allocation7], 256  }
  0x1c   :  { %262 = vsyncadd [#allocation7], 4294967040  ;;  %vm48_vm0 = vcmask 785408   ;;  %v269_v0 = vmov 0.0   ;;  %vm270_vm1 = vmmov 0   ;;  %v196_v1 = vld [vmem:[#allocation6 + $0x8] sm:$0xff]  }
  0x1d   :  { %49 = vst.msk [vmem:[#allocation2] sm:$0xff] %vm48_vm0, %v269_v0  ;;  %50 = vst.msk [vmem:[#allocation2 + $0x8] sm:$0xff] %vm48_vm0, %v269_v0  ;;  %181 = vmatprep.subr.bf16.mxu0 %v269_v0  ;;  %185 = vmatprep.mubr.msk.bf16.mxu0 %vm270_vm1, %v269_v0  ;;  %v197_v2 = vld [vmem:[#allocation6] sm:$0xff]   ;;  %v198_v3 = vld [vmem:[#allocation3] sm:$0xff]   ;;  %vm76_vm2 = vcmask 261120   ;;  %vm148_vm3 = vcmask 781312  }
  0x1e   :  { %182 = vmatpush3.bf16.msra.mxu0 %v196_v1  ;;  %v173_v12 = vld [vmem:[%s319_s2] ss:$0 sm:$0xff]  ;;  %s271_s24 = smov [#allocation8]  }
  0x1f   :  { %183 = vmatprep.subr.bf16.mxu0 %v269_v0  ;;  %s156_s25 = sshll.u32 %s271_s24, 4  ;;  %s157_s25 = int_to_ptr.vmem [resolvable:$true] %s156_s25 }
  0x20   :  { %s239_s26 = scalar_lea.vmem %s157_s25, 128  ;;  %p244_p11 = scmp.lt.s32.totalorder %s157_s25, %s157_s25 }
  0x21   :  { %p240_p10 = scmp.ne.s32.totalorder %s157_s25, %s239_s26  ;;  %p245_p12 = scmp.lt.s32.totalorder %s239_s26, %s239_s26 }
  0x22   :  { %184 = vmatpush3.bf16.msra.mxu0 %v197_v2 }
  0x23   :  { %p246_p13 = por %p245_p12, %p244_p11 }
  0x24   :  { %v51_v4 = vld [vmem:[#allocation2] sm:$0xff]  ;;  %v52_v8 = vld [vmem:[#allocation2 + $0x8] sm:$0xff] }
  0x25   :  { %186 = vmatmul.mubr.msk.bf16.vlgmr.msra.gmra.mxu0 %vm76_vm2, %v198_v3  ;;  %p247_p0 = pnand %p246_p13, %p240_p10 }
  0xe5   :  { %v114_v5 = vpop.f32.mrf.mxu0 }
  0xe6   :  { %v121_v6 = vadd.f32 %v114_v5, %v51_v4 }
  0xe7   :  { %v187_v7 = vpop.f32.mrf.mxu0 }
  0xe8   :  { %124 = vst.msk [vmem:[#allocation2] sm:$0xff] %vm48_vm0, %v121_v6 }
  0xe9   :  { %v117_v9 = vpop.f32.mrf.mxu0 }
  0xea   :  { %v122_v10 = vadd.f32 %v117_v9, %v52_v8 }
  0xeb   :  { %v188_v11 = vpop.f32.mrf.mxu0 }
  0xec   :  { %125 = vst.msk [vmem:[#allocation2 + $0x8] sm:$0xff] %vm48_vm0, %v122_v10 }
  0xef   :  { %v129_v13 = vld [vmem:[#allocation2] sm:$0xff] }
  0xf0   :  { %v138_v14 = vadd.f32 %v173_v12, %v129_v13 }
  0xf2   :  { %v176_v15 = vpack.c.bf16 %v138_v14, %v138_v14 }
  0xf3   :  { %v130_v16 = vld [vmem:[#allocation2 + $0x8] sm:$0xff] }
  0xf4   :  { %v139_v17 = vadd.f32 %v173_v12, %v130_v16  ;;  %149 = vst.msk [vmem:[#allocation8] sm:$0xf] %vm148_vm3, %v176_v15 }
  0xf6   :  { %v177_v18 = vpack.c.bf16 %v139_v17, %v139_v17 }
  0xf8   :  { %150 = vst.msk [vmem:[#allocation8 + $0x4] sm:$0xf] %vm148_vm3, %v177_v18 }
  0xf9   :  { %250 = shalt.err (!%p247_p0)
}
  0xfa   :  { %162 = dma.vmem_to_hbm [thread:$0]  %s157_s25, 128, %s320_s3, [#allocation5], %s266_s15, %s266_s15, %s267_s16  }
  0xfb   :  { %263 = dma.done.wait [#allocation5], 128  }
  0xfc   :  { %264 = vsyncadd [#allocation5], 4294967168 }
  0xfd   :  { %166 = vsyncpa [#allocation4], 1 }
  0xfe   :  { %167 = vsyncpa [#allocation7], 1 }
  0xff   :  { %168 = vsyncpa [#allocation5], 1 }

</bundles_post_ra>
